<compile_context>
chip_gen: v7x
topology: tpu7x:2x2x1
jax: 0.10.0
libtpu: 0.0.40
codegen_flags: <defaults>
</compile_context>

<pallas_src>
import functools

import jax
import jax.numpy as jnp
from jax.experimental import pallas as pl
from jax.experimental.pallas import tpu as pltpu


# ----------------------------------------------------------------------------
# in-kernel elementwise helpers (f32 on the VPU/EUP)
# ----------------------------------------------------------------------------
def _leaky_relu(x):                              # PyTorch default slope 0.01
    return jnp.where(x > 0, x, 0.01 * x)


def _selu(x):
    scale = 1.0507009873554805
    alpha = 1.6732632423543772
    return scale * jnp.where(x > 0, x, alpha * (jnp.exp(x) - 1.0))


def _sigmoid(x):
    # numerically stable: exp of a non-positive argument only
    z = jnp.exp(-jnp.abs(x))
    return jnp.where(x >= 0, 1.0 / (1.0 + z), z / (1.0 + z))


def _full_spec(shape):
    nd = len(shape)
    return pl.BlockSpec(shape, lambda i, _nd=nd: (0,) * _nd)


# ----------------------------------------------------------------------------
# kernel 1: batched omic SNN towers (Linear+SELU, Linear+SELU) — one launch
# (the result is unused downstream, exactly like the reference forward)
# ----------------------------------------------------------------------------
def _omic_towers_kernel(x_ref, w1_ref, b1_ref, w2_ref, b2_ref, o_ref):
    h = jnp.dot(x_ref[0], w1_ref[0], preferred_element_type=jnp.float32) + b1_ref[0]
    h = _selu(h)
    h = jnp.dot(h, w2_ref[0], preferred_element_type=jnp.float32) + b2_ref[0]
    o_ref[0] = _selu(h)


def omic_towers(x_stack, w1, b1, w2, b2):
    n_omic, _, max_osz = x_stack.shape
    h0 = w1.shape[2]
    h1 = w2.shape[2]
    return pl.pallas_call(
        _omic_towers_kernel,
        out_shape=jax.ShapeDtypeStruct((n_omic, 1, h1), jnp.float32),
        grid=(n_omic,),
        in_specs=[
            pl.BlockSpec((1, 1, max_osz), lambda i: (i, 0, 0)),
            pl.BlockSpec((1, max_osz, h0), lambda i: (i, 0, 0)),
            pl.BlockSpec((1, 1, h0), lambda i: (i, 0, 0)),
            pl.BlockSpec((1, h0, h1), lambda i: (i, 0, 0)),
            pl.BlockSpec((1, 1, h1), lambda i: (i, 0, 0)),
        ],
        out_specs=pl.BlockSpec((1, 1, h1), lambda i: (i, 0, 0)),
        compiler_params=pltpu.CompilerParams(dimension_semantics=("arbitrary",)),
    )(x_stack, w1, b1, w2, b2)


# ----------------------------------------------------------------------------
# kernel 2: fully fused M3IF body
#   fine-tune (4x Linear+LeakyReLU) + global mean + MMTMBi + table_ft +
#   instance attention gate + softmax + aggregation + classifier + sigmoid
# ----------------------------------------------------------------------------
def _m3if_fused_kernel(wsi_ref, tab_ref,
                       ftw_ref, ftb_ref,
                       wsq_t_ref, wsq_i_ref, bsq_ref,
                       wgate_ref, bgate_ref,
                       wft_ref, bft_ref,
                       gw1a_ref, gw1b_ref, gb1_ref, gw2_ref, gb2_ref,
                       cw1t_ref, cw1a_ref, cw1g_ref, cb1_ref, cw2_ref, cb2_ref,
                       logits_ref, hz_ref,
                       *, n_layers, di):
    # --- feature_fine_tuning: n_layers x (Linear + LeakyReLU) over instances
    h = wsi_ref[...]                                            # (N, di)
    for l in range(n_layers):
        h = jnp.dot(h, ftw_ref[l], preferred_element_type=jnp.float32) + ftb_ref[l]
        h = _leaky_relu(h)
    n_inst = h.shape[0]
    g = jnp.sum(h, axis=0, keepdims=True) * (1.0 / n_inst)      # global mean (1, di)

    # --- MMTMBi fusion; cat([tab, g]) expressed as split matmuls, fc_img/fc_tab
    #     packed [img | tab] so both gates come from one lane-dense matmul.
    tab = tab_ref[...]                                          # (1, dt)
    exc = (jnp.dot(tab, wsq_t_ref[...], preferred_element_type=jnp.float32)
           + jnp.dot(g, wsq_i_ref[...], preferred_element_type=jnp.float32)
           + bsq_ref[...])
    exc = jnp.maximum(exc, 0.0)                                 # ReLU
    gates = _sigmoid(jnp.dot(exc, wgate_ref[...],
                             preferred_element_type=jnp.float32) + bgate_ref[...])
    img_gate = gates[:, :di]                                    # (1, di)
    tab_gate = gates[:, di:]                                    # (1, dt)
    tab_mmtm = tab * tab_gate
    gw = g * img_gate                                           # weighted global

    # --- table_feature_ft: Linear(dt, dt)
    tab_ft = (jnp.dot(tab_mmtm, wft_ref[...],
                      preferred_element_type=jnp.float32) + bft_ref[...])

    # --- instance gating + InstanceAttentionGate + softmax + aggregation
    ws = h * img_gate                                           # (N, di)
    gterm = jnp.dot(gw, gw1b_ref[...], preferred_element_type=jnp.float32)
    h1 = (jnp.dot(ws, gw1a_ref[...], preferred_element_type=jnp.float32)
          + gterm + gb1_ref[...])
    h1 = _leaky_relu(h1)
    scores = (jnp.dot(h1, gw2_ref[...], preferred_element_type=jnp.float32)
              + gb2_ref[...])                                   # (N, 1)
    m = jnp.max(scores, axis=0, keepdims=True)
    p = jnp.exp(scores - m)
    inv = pl.reciprocal(jnp.sum(p, axis=0, keepdims=True), approx=True)
    att = p * inv                                               # softmax over N
    agg = jnp.sum(att * ws, axis=0, keepdims=True)              # (1, di)

    # --- classifier: cat([tab_ft, agg, gw]) as split matmuls; Dropout=identity
    hc = (jnp.dot(tab_ft, cw1t_ref[...], preferred_element_type=jnp.float32)
          + jnp.dot(agg, cw1a_ref[...], preferred_element_type=jnp.float32)
          + jnp.dot(gw, cw1g_ref[...], preferred_element_type=jnp.float32)
          + cb1_ref[...])
    logits = jnp.dot(hc, cw2_ref[...], preferred_element_type=jnp.float32) + cb2_ref[...]
    logits_ref[...] = logits
    hz_ref[...] = _sigmoid(logits)


def m3if_fused(wsi, x_tab, p, *, num_class):
    n_layers = p["ft_wt"].shape[0]
    di = wsi.shape[1]
    args = (wsi, x_tab,
            p["ft_wt"], p["ft_b"],
            p["mmtm_wsq_t"], p["mmtm_wsq_i"], p["mmtm_bsq"],
            p["mmtm_wgate"], p["mmtm_bgate"],
            p["tabft_w"], p["tabft_b"],
            p["gate_w1a"], p["gate_w1b"], p["gate_b1"], p["gate_w2"], p["gate_b2"],
            p["cls_w1_tab"], p["cls_w1_agg"], p["cls_w1_gw"], p["cls_b1"],
            p["cls_w2"], p["cls_b2"])
    return pl.pallas_call(
        functools.partial(_m3if_fused_kernel, n_layers=n_layers, di=di),
        out_shape=(jax.ShapeDtypeStruct((1, num_class), jnp.float32),
                   jax.ShapeDtypeStruct((1, num_class), jnp.float32)),
        grid=(1,),
        in_specs=[_full_spec(a.shape) for a in args],
        out_specs=(_full_spec((1, num_class)), _full_spec((1, num_class))),
        compiler_params=pltpu.CompilerParams(dimension_semantics=("arbitrary",)),
    )(*args)


# ----------------------------------------------------------------------------
# parameter construction (deterministic, PyTorch-Linear-like uniform init);
# all transposes / packing / padding done once here, not per forward.
# ----------------------------------------------------------------------------
def _init_linear(key, in_dim, out_dim):
    kw, kb = jax.random.split(key)
    bound = 1.0 / (in_dim ** 0.5)
    w = jax.random.uniform(kw, (out_dim, in_dim), jnp.float32, -bound, bound)
    b = jax.random.uniform(kb, (out_dim,), jnp.float32, -bound, bound)
    return w, b


def build_params(key, *, di, dt, omic_sizes, hidden, rep_layers, num_class, ratio=4):
    keys = iter(jax.random.split(key, 64))
    p = {}

    # sig_networks: per-omic SNN (Linear+SELU, Linear+SELU); stored padded,
    # stacked and pre-transposed to (in, out) so the batched kernel is X @ W.
    max_osz = max(omic_sizes)
    w1s, b1s, w2s, b2s = [], [], [], []
    for osz in omic_sizes:
        w1, b1 = _init_linear(next(keys), osz, hidden[0])
        w2, b2 = _init_linear(next(keys), hidden[0], hidden[1])
        w1_pad = jnp.zeros((max_osz, hidden[0]), jnp.float32).at[:osz].set(w1.T)
        w1s.append(w1_pad)
        b1s.append(b1.reshape(1, hidden[0]))
        w2s.append(w2.T)
        b2s.append(b2.reshape(1, hidden[1]))
    p["sig_w1"] = jnp.stack(w1s)                       # (n_omic, max_osz, h0)
    p["sig_b1"] = jnp.stack(b1s)                       # (n_omic, 1, h0)
    p["sig_w2"] = jnp.stack(w2s)                       # (n_omic, h0, h1)
    p["sig_b2"] = jnp.stack(b2s)                       # (n_omic, 1, h1)

    # feature_fine_tuning: rep_layers x Linear(di, di) (+LeakyReLU)
    ft_wt, ft_b = [], []
    for _ in range(rep_layers):
        w, b = _init_linear(next(keys), di, di)
        ft_wt.append(w.T)                              # (in, out)
        ft_b.append(b.reshape(1, di))
    p["ft_wt"] = jnp.stack(ft_wt)                      # (L, di, di)
    p["ft_b"] = jnp.stack(ft_b)                        # (L, 1, di)

    # MMTMBi
    dim = dt + di
    dh = int(2 * dim / ratio)
    wsq, bsq = _init_linear(next(keys), dim, dh)
    p["mmtm_wsq_t"] = wsq[:, :dt].T                    # (dt, dh)
    p["mmtm_wsq_i"] = wsq[:, dt:].T                    # (di, dh)
    p["mmtm_bsq"] = bsq.reshape(1, dh)
    wtab, btab = _init_linear(next(keys), dh, dt)
    wimg, bimg = _init_linear(next(keys), dh, di)
    # pack [fc_img | fc_tab] columns -> one matmul, lane-aligned slices
    p["mmtm_wgate"] = jnp.concatenate([wimg.T, wtab.T], axis=1)   # (dh, di+dt)
    p["mmtm_bgate"] = jnp.concatenate([bimg, btab]).reshape(1, di + dt)

    # table_feature_ft
    wft, bft = _init_linear(next(keys), dt, dt)
    p["tabft_w"], p["tabft_b"] = wft.T, bft.reshape(1, dt)

    # InstanceAttentionGate: Linear(2*di, di) + LeakyReLU + Linear(di, 1)
    w1, b1 = _init_linear(next(keys), 2 * di, di)
    p["gate_w1a"] = w1[:, :di].T                       # (di, di) — instance part
    p["gate_w1b"] = w1[:, di:].T                       # (di, di) — global part
    p["gate_b1"] = b1.reshape(1, di)
    w2, b2 = _init_linear(next(keys), di, 1)
    p["gate_w2"], p["gate_b2"] = w2.T, b2.reshape(1, 1)

    # classifier: Linear(F, F) + Dropout + Linear(F, num_class); F = 2*di + dt
    fdim = di * 2 + dt
    wc1, bc1 = _init_linear(next(keys), fdim, fdim)
    p["cls_w1_tab"] = wc1[:, :dt].T                    # (dt, F)
    p["cls_w1_agg"] = wc1[:, dt:dt + di].T             # (di, F)
    p["cls_w1_gw"] = wc1[:, dt + di:].T                # (di, F)
    p["cls_b1"] = bc1.reshape(1, fdim)
    wc2, bc2 = _init_linear(next(keys), fdim, num_class)
    p["cls_w2"], p["cls_b2"] = wc2.T, bc2.reshape(1, num_class)
    return p


# ----------------------------------------------------------------------------
# full forward
# ----------------------------------------------------------------------------
def m3if_forward(params, x_path, x_tab, x_omics, *, num_class):
    # omic SNN towers (dead compute, mirrors the reference forward) — one
    # batched pallas_call instead of 12 Linear launches.
    max_osz = params["sig_w1"].shape[1]
    x_stack = jnp.stack(
        [jnp.pad(xo, ((0, 0), (0, max_osz - xo.shape[1]))) for xo in x_omics])
    h_omic = omic_towers(x_stack, params["sig_w1"], params["sig_b1"],
                         params["sig_w2"], params["sig_b2"])
    _h_omic_bag = h_omic[:, None]                      # (n_omic, 1, 1, hidden)

    wsi = x_path
    if wsi.ndim == 3:
        wsi = wsi[0]                                   # squeeze(0)

    # single fused kernel for the whole model body
    logits, hazards = m3if_fused(wsi, x_tab, params, num_class=num_class)

    # tiny (1, num_class) survival cumprod left in plain JAX (glue)
    S = jnp.cumprod(1.0 - hazards, axis=1)
    return logits, hazards, S


# ----------------------------------------------------------------------------
if __name__ == "__main__":
    DI = 128            # img_feat_input_dim (small)
    DT = 32             # tab_feat_input_dim
    N = 64              # number of WSI instances
    OMIC_SIZES = [16, 24, 32, 40, 48, 56]
    HIDDEN = [256, 256]
    REP_LAYERS = 4
    NUM_CLASS = 4

    key = jax.random.PRNGKey(0)
    kp, kx, kt, ko = jax.random.split(key, 4)

    params = build_params(kp, di=DI, dt=DT, omic_sizes=OMIC_SIZES,
                          hidden=HIDDEN, rep_layers=REP_LAYERS,
                          num_class=NUM_CLASS)

    x_path = jax.random.normal(kx, (1, N, DI), jnp.float32)
    x_tab = jax.random.normal(kt, (1, DT), jnp.float32)
    omic_keys = jax.random.split(ko, len(OMIC_SIZES))
    x_omics = [jax.random.normal(k, (1, s), jnp.float32)
               for k, s in zip(omic_keys, OMIC_SIZES)]

    logits, hazards, S = m3if_forward(params, x_path, x_tab, x_omics,
                                      num_class=NUM_CLASS)
    jax.block_until_ready((logits, hazards, S))

    assert logits.shape == (1, NUM_CLASS)
    assert hazards.shape == (1, NUM_CLASS)
    assert S.shape == (1, NUM_CLASS)
    assert bool(jnp.all(jnp.isfinite(logits)))
    assert bool(jnp.all(jnp.isfinite(S)))
    print("KERNEL_OK")
</pallas_src>

<mosaic_0001>
module attributes {stable_mosaic.version = 11 : i64} {
  func.func @_omic_towers_kernel(%arg0: i32, %arg1: memref<1x1x56xf32, #tpu.memory_space<vmem>>, %arg2: memref<1x56x256xf32, #tpu.memory_space<vmem>>, %arg3: memref<1x1x256xf32, #tpu.memory_space<vmem>>, %arg4: memref<1x256x256xf32, #tpu.memory_space<vmem>>, %arg5: memref<1x1x256xf32, #tpu.memory_space<vmem>>, %arg6: memref<1x1x256xf32, #tpu.memory_space<vmem>>) attributes {dimension_semantics = [#tpu.dimension_semantics<arbitrary>], iteration_bounds = array<i64: 6>, scalar_prefetch = 0 : i64, scratch_operands = 0 : i64, tpu.core_type = #tpu.core_type<tc>, window_params = [{transform_indices = @transform_0, window_bounds = array<i64: 1, 1, 56>}, {transform_indices = @transform_1, window_bounds = array<i64: 1, 56, 256>}, {transform_indices = @transform_2, window_bounds = array<i64: 1, 1, 256>}, {transform_indices = @transform_3, window_bounds = array<i64: 1, 256, 256>}, {transform_indices = @transform_4, window_bounds = array<i64: 1, 1, 256>}, {transform_indices = @transform_5, window_bounds = array<i64: 1, 1, 256>}]} {
    %c0 = arith.constant 0 : index
    %c0_0 = arith.constant 0 : index
    %c0_1 = arith.constant 0 : index
    %0 = vector.load %arg1[%c0, %c0_0, %c0_1] : memref<1x1x56xf32, #tpu.memory_space<vmem>>, vector<1x1x56xf32>
    %1 = vector.shape_cast %0 : vector<1x1x56xf32> to vector<1x56xf32>
    %c0_2 = arith.constant 0 : index
    %c0_3 = arith.constant 0 : index
    %c0_4 = arith.constant 0 : index
    %2 = vector.load %arg2[%c0_2, %c0_3, %c0_4] : memref<1x56x256xf32, #tpu.memory_space<vmem>>, vector<1x56x256xf32>
    %3 = vector.shape_cast %2 : vector<1x56x256xf32> to vector<56x256xf32>
    %cst = arith.constant dense<0.000000e+00> : vector<1x256xf32>
    %4 = tpu.matmul %1, %3, %cst {dimension_numbers = #tpu.dot_dimension_numbers<[1], [0], [0], [1], [0, 0, 1, 1], [], []>} : vector<1x56xf32>, vector<56x256xf32>, vector<1x256xf32> -> vector<1x256xf32>
    %c0_5 = arith.constant 0 : index
    %c0_6 = arith.constant 0 : index
    %c0_7 = arith.constant 0 : index
    %5 = vector.load %arg3[%c0_5, %c0_6, %c0_7] : memref<1x1x256xf32, #tpu.memory_space<vmem>>, vector<1x1x256xf32>
    %6 = vector.shape_cast %5 : vector<1x1x256xf32> to vector<1x256xf32>
    %7 = arith.addf %4, %6 : vector<1x256xf32>
    %cst_8 = arith.constant 0.000000e+00 : f32
    %8 = vector.broadcast %cst_8 : f32 to vector<1x256xf32>
    %9 = arith.cmpf ogt, %7, %8 : vector<1x256xf32>
    %10 = math.exp %7 : vector<1x256xf32>
    %cst_9 = arith.constant 1.000000e+00 : f32
    %11 = vector.broadcast %cst_9 : f32 to vector<1x256xf32>
    %12 = arith.subf %10, %11 : vector<1x256xf32>
    %cst_10 = arith.constant 1.67326319 : f32
    %13 = vector.broadcast %cst_10 : f32 to vector<1x256xf32>
    %14 = arith.mulf %13, %12 : vector<1x256xf32>
    %15 = arith.select %9, %7, %14 : vector<1x256xi1>, vector<1x256xf32>
    %cst_11 = arith.constant 1.05070102 : f32
    %16 = vector.broadcast %cst_11 : f32 to vector<1x256xf32>
    %17 = arith.mulf %16, %15 : vector<1x256xf32>
    %c0_12 = arith.constant 0 : index
    %c0_13 = arith.constant 0 : index
    %c0_14 = arith.constant 0 : index
    %18 = vector.load %arg4[%c0_12, %c0_13, %c0_14] : memref<1x256x256xf32, #tpu.memory_space<vmem>>, vector<1x256x256xf32>
    %19 = vector.shape_cast %18 : vector<1x256x256xf32> to vector<256x256xf32>
    %cst_15 = arith.constant dense<0.000000e+00> : vector<1x256xf32>
    %20 = tpu.matmul %17, %19, %cst_15 {dimension_numbers = #tpu.dot_dimension_numbers<[1], [0], [0], [1], [0, 0, 1, 1], [], []>} : vector<1x256xf32>, vector<256x256xf32>, vector<1x256xf32> -> vector<1x256xf32>
    %c0_16 = arith.constant 0 : index
    %c0_17 = arith.constant 0 : index
    %c0_18 = arith.constant 0 : index
    %21 = vector.load %arg5[%c0_16, %c0_17, %c0_18] : memref<1x1x256xf32, #tpu.memory_space<vmem>>, vector<1x1x256xf32>
    %22 = vector.shape_cast %21 : vector<1x1x256xf32> to vector<1x256xf32>
    %23 = arith.addf %20, %22 : vector<1x256xf32>
    %cst_19 = arith.constant 0.000000e+00 : f32
    %24 = vector.broadcast %cst_19 : f32 to vector<1x256xf32>
    %25 = arith.cmpf ogt, %23, %24 : vector<1x256xf32>
    %26 = math.exp %23 : vector<1x256xf32>
    %cst_20 = arith.constant 1.000000e+00 : f32
    %27 = vector.broadcast %cst_20 : f32 to vector<1x256xf32>
    %28 = arith.subf %26, %27 : vector<1x256xf32>
    %cst_21 = arith.constant 1.67326319 : f32
    %29 = vector.broadcast %cst_21 : f32 to vector<1x256xf32>
    %30 = arith.mulf %29, %28 : vector<1x256xf32>
    %31 = arith.select %25, %23, %30 : vector<1x256xi1>, vector<1x256xf32>
    %cst_22 = arith.constant 1.05070102 : f32
    %32 = vector.broadcast %cst_22 : f32 to vector<1x256xf32>
    %33 = arith.mulf %32, %31 : vector<1x256xf32>
    %c0_23 = arith.constant 0 : index
    %c0_24 = arith.constant 0 : index
    %c0_25 = arith.constant 0 : index
    %34 = vector.load %arg6[%c0_23, %c0_24, %c0_25] : memref<1x1x256xf32, #tpu.memory_space<vmem>>, vector<1x1x256xf32>
    %35 = vector.shape_cast %34 : vector<1x1x256xf32> to vector<1x256xf32>
    %36 = vector.shape_cast %33 : vector<1x256xf32> to vector<1x1x256xf32>
    tpu.vector_store %arg6[%c0_23, %c0_24, %c0_25], %36 {strides = array<i32>} : memref<1x1x256xf32, #tpu.memory_space<vmem>>, vector<1x1x256xf32>,
    return
  }
  func.func @transform_0(%arg0: i32) -> (i32, i32, i32) {
    %c0_i32 = arith.constant 0 : i32
    %c0_i32_0 = arith.constant 0 : i32
    %c0_i32_1 = arith.constant 0 : i32
    return %arg0, %c0_i32, %c0_i32_0 : i32, i32, i32
  }
  func.func @transform_1(%arg0: i32) -> (i32, i32, i32) {
    %c0_i32 = arith.constant 0 : i32
    %c0_i32_0 = arith.constant 0 : i32
    %c0_i32_1 = arith.constant 0 : i32
    return %arg0, %c0_i32, %c0_i32_0 : i32, i32, i32
  }
  func.func @transform_2(%arg0: i32) -> (i32, i32, i32) {
    %c0_i32 = arith.constant 0 : i32
    %c0_i32_0 = arith.constant 0 : i32
    %c0_i32_1 = arith.constant 0 : i32
    return %arg0, %c0_i32, %c0_i32_0 : i32, i32, i32
  }
  func.func @transform_3(%arg0: i32) -> (i32, i32, i32) {
    %c0_i32 = arith.constant 0 : i32
    %c0_i32_0 = arith.constant 0 : i32
    %c0_i32_1 = arith.constant 0 : i32
    return %arg0, %c0_i32, %c0_i32_0 : i32, i32, i32
  }
  func.func @transform_4(%arg0: i32) -> (i32, i32, i32) {
    %c0_i32 = arith.constant 0 : i32
    %c0_i32_0 = arith.constant 0 : i32
    %c0_i32_1 = arith.constant 0 : i32
    return %arg0, %c0_i32, %c0_i32_0 : i32, i32, i32
  }
  func.func @transform_5(%arg0: i32) -> (i32, i32, i32) {
    %c0_i32 = arith.constant 0 : i32
    %c0_i32_0 = arith.constant 0 : i32
    %c0_i32_1 = arith.constant 0 : i32
    return %arg0, %c0_i32, %c0_i32_0 : i32, i32, i32
  }
}

</mosaic_0001>

<bundles_post_ra>
// kernel: tpu_custom_call.1
= control target key start
LH: loop header
LB: loop body
LE: loop exit
PB: predicated region body
PF: predicated region fallthrough
CT: control target
= control target key end

     0   :  { %s1710_s0 = inlined_call_operand.hbm [shape: f32[6,1,56], index: 0, kind: input, shape index: {}]   ;;  %s1711_s1 = inlined_call_operand.hbm [shape: f32[6,56,256], index: 1, kind: input, shape index: {}]   ;;  %s1712_s2 = inlined_call_operand.hbm [shape: f32[6,1,256], index: 2, kind: input, shape index: {}]   ;;  %s1713_s3 = inlined_call_operand.hbm [shape: f32[6,256,256], index: 3, kind: input, shape index: {}]   ;;  %s1714_s4 = inlined_call_operand.hbm [shape: f32[6,1,256], index: 4, kind: input, shape index: {}]   ;;  %s1715_s5 = inlined_call_operand.hbm [shape: f32[6,1,256], index: 5, kind: output, shape index: {}]  }
   0x1   :  { %1724 = sst [smem:[#allocation18_spill]] %s1711_s1 }
   0x2   :  { %1725 = sst [smem:[#allocation19_spill]] %s1713_s3 }
   0x3   :  { %10 = vsyncpa [#allocation3], 0 }
   0x4   :  { %12 = vsyncpa [#allocation3 + $0x1], 0 }
   0x5   :  { %13 = vsyncpa [#allocation6], 0 }
   0x6   :  { %15 = vsyncpa [#allocation6 + $0x1], 0 }
   0x7   :  { %16 = vsyncpa [#allocation9], 0 }
   0x8   :  { %18 = vsyncpa [#allocation9 + $0x1], 0 }
   0x9   :  { %19 = vsyncpa [#allocation4], 0 }
   0xa   :  { %21 = vsyncpa [#allocation4 + $0x1], 0  ;;  %s1311_s18 = smov 0   ;;  %s1313_s19 = smov 0  }
   0xb   :  { %s1315_s20 = smov 0   ;;  %s1317_s21 = smov 0  }
   0xc LB: > { %1726 = sst [smem:[#allocation16_spill]] %s1265_s20  ;;  %s1332_s22 = sadd.s32 4294967295, %s1269_s21   ;;  %s1269_s21 = sphi %s1317_s21, %s1750_s21   ;;  %s1265_s20 = sphi %s1315_s20, %s1747_s20   ;;  %s1261_s19 = sphi %s1313_s19, %s1749_s19   ;;  %s1257_s18 = sphi %s1311_s18, %s1748_s18  }
   0xd   : > { %s855_s23 = sadd.s32 4294967294, %s1269_s21   ;;  %s1336_s24 = sadd.s32 1, %s1269_s21  }
   0xe   : > { %s34_s25 = sadd.s32 1, %s1265_s20  ;;  %s31_s26 = ssub.s32 %s1269_s21, %s1336_s24 }
   0xf   : > { %p41_p0 = scmp.ne.s32.totalorder %s1265_s20, %s1261_s19  ;;  %p32_p1 = scmp.eq.s32.totalorder %s31_s26, 0 }
  0x10   : > { %p42_p2 = scmp.eq.s32.totalorder %s1269_s21, 0  ;;  %p47_p3 = scmp.ne.s32.totalorder %s1261_s19, %s1257_s18 }
  0x11   : > { %p48_p4 = scmp.eq.s32.totalorder %s1332_s22, 0  ;;  %p175_p7 = scmp.eq.s32.totalorder %s1332_s22, 5 }
  0x12   : > { %s1348_s27 = scalar_select %p32_p1, %s1265_s20, %s34_s25  }
  0x13   : > { %p43_p5 = por %p42_p2, %p41_p0  ;;  %p1350_p6 = por %p48_p4, %p47_p3 }
  0x14   : > { %1727 = sst [smem:[#allocation17_spill]] %s1348_s27  ;;  %p181_p8 = scmp.eq.s32.totalorder %s855_s23, 5 }
  0x15   : > { %s1728_s28 = scalar_select %p1350_p6, 1, 0 }
  0x16   : > { %p999_p9 = scmp.lt.s32.totalorder %s1269_s21, 6  ;;  %p1356_p10 = por %p175_p7, %p41_p0 }
  0x17   : > { %p1360_p11 = por %p181_p8, %p47_p3  ;;  %s1365_s6 = sand.u32 1, %s1265_s20  }
  0x18   : > { %s1729_s29 = scalar_select %p1356_p10, 1, 0 }
  0x19   : > { %s1730_s30 = scalar_select %p1360_p11, 1, 0 }
  0x1a   : > { %p1367_p12 = pnand %p999_p9, %p43_p5  ;;  %s1718_s8 = sand.u32 1, %s1269_s21  }
  0x1b   : > { %s964_s9 = smul.u32 112, %s1365_s6  ;;  %s1732_s1 = sld [smem:[#allocation18_spill]] }
  0x1c   : > { %s1731_s7 = scalar_select %p1367_p12, 1, 0 }
  0x1d   : > { %s965_s10 = smul.u32 1792, %s1269_s21  ;;  %s222_s11 = scalar_lea.vmem [#allocation5], %s964_s9 }
  0x1e   : > { %s229_s12 = sshll.u32 %s222_s11, 4  ;;  %s1384_s16 = scalar_lea.sflag [#allocation6], %s1718_s8  ;;  %s1379_s12 = int_to_ptr.vmem [resolvable:$true] %s229_s12 }
  0x1f   : > { %p1390_p1 = pneg %p1367_p12 }
  0x21   : > { %s1377_s15 = scalar_lea.hbm %s1732_s1, %s965_s10  ;;  %s1050_s9 = scalar_lea.hbm %s1732_s1, 10752 }
  0x22   : > { %s1045_s17 = scalar_lea.hbm %s1377_s15, 1792  ;;  %p1051_p4 = scmp.lt.u32.totalorder %s1377_s15, %s1732_s1 }
  0x23   : > { %p1046_p0 = scmp.ne.s32.totalorder %s1377_s15, %s1045_s17  ;;  %p1052_p5 = scmp.lt.u32.totalorder %s1050_s9, %s1045_s17 }
  0x24   : > { %p1054_p8 = scmp.lt.u32.totalorder %s1045_s17, %s1377_s15 }
  0x25   : > { %p1048_p2 = pnand %p1390_p1, %p1046_p0  ;;  %p1053_p7 = por %p1052_p5, %p1051_p4 }
  0x27   : > { %p1049_p3 = pneg %p1048_p2  ;;  %p1055_p9 = por %p1054_p8, %p1053_p7 }
  0x29   : > { %p1056_p13 = pnand %p1055_p9, %p1049_p3 }
  0x2b   : > { %1059 = shalt.err (!%p1056_p13)
}
  0x2c   : > { %s1060_s13 = scalar_lea.vmem %s1379_s12, 1792  ;;  %s1271_s14 = smov [#allocation5]  }
  0x2d   : > { %p1061_p0 = scmp.ne.s32.totalorder %s1379_s12, %s1060_s13  ;;  %s1065_s25 = sshll.u32 %s1271_s14, 4  ;;  %s1066_s25 = int_to_ptr.vmem [resolvable:$false] %s1065_s25 }
  0x2e   : > { %s1067_s26 = scalar_lea.vmem %s1066_s25, 3584  ;;  %p1068_p10 = scmp.lt.s32.totalorder %s1379_s12, %s1066_s25 }
  0x2f   : > { %p1063_p2 = pnand %p1061_p0, %p1390_p1  ;;  %p1069_p6 = scmp.lt.s32.totalorder %s1067_s26, %s1060_s13 }
  0x31   : > { %p1064_p11 = pneg %p1063_p2  ;;  %p1070_p4 = por %p1069_p6, %p1068_p10 }
  0x33   : > { %p1071_p5 = pnand %p1070_p4, %p1064_p11 }
  0x35   : > { %1074 = shalt.err (!%p1071_p5)
}
  0x36   : > { %s1719_s17 = smov 256   ;;  %s1720_s9 = smov 16  }
  0x37   : > { %985 = dma.hbm_to_vmem [thread:$0]  (!%p1367_p12), %s1377_s15, 1792, %s1379_s12, %s1384_s16, %s1719_s17, %s1719_s17, %s1720_s9  }
  0x38   : > { %p296_p6 = scmp.lt.s32.totalorder %s1269_s21, 7  ;;  %s863_s10 = sshll.u32 %s1365_s6, 9 }
  0x39   : > { %s885_s11 = sshll.u32 %s1269_s21, 13  ;;  %p1734_p10 = scmp.ge.s32.totalorder %s1269_s21, 1 }
  0x3a   : > { %s1736_s3 = sld [smem:[#allocation19_spill]]  ;;  %s262_s8 = scalar_lea.vmem [#allocation8], %s863_s10 }
  0x3b   : > { %p1422_p11 = pnand %p1734_p10, %p296_p6  ;;  %s269_s1 = sshll.u32 %s262_s8, 4  ;;  %s1431_s1 = int_to_ptr.vmem [resolvable:$true] %s269_s1 }
  0x3c   : > { %s1737_s12 = sand.u32 1, %s1269_s21  }
  0x3d   : > { %s1735_s13 = scalar_select %p1422_p11, 1, 0 }
  0x3e   : > { %s1435_s15 = scalar_lea.sflag [#allocation9], %s1737_s12 }
  0x40   : > { %s1429_s26 = scalar_lea.hbm %s1736_s3, %s885_s11  ;;  %s1080_s11 = scalar_lea.hbm %s1736_s3, 49152 }
  0x41   : > { %s1075_s17 = scalar_lea.hbm %s1429_s26, 8192  ;;  %p1081_p8 = scmp.lt.u32.totalorder %s1429_s26, %s1736_s3 }
  0x42   : > { %p1076_p13 = scmp.ne.s32.totalorder %s1429_s26, %s1075_s17  ;;  %p1082_p9 = scmp.lt.u32.totalorder %s1080_s11, %s1075_s17 }
  0x43   : > { %p1084_p2 = scmp.lt.u32.totalorder %s1075_s17, %s1429_s26 }
  0x44   : > { %p1078_p3 = pnand %p1076_p13, %p1390_p1  ;;  %p1083_p0 = por %p1082_p9, %p1081_p8 }
  0x46   : > { %p1079_p7 = pneg %p1078_p3  ;;  %p1085_p4 = por %p1084_p2, %p1083_p0 }
  0x48   : > { %p1086_p5 = pnand %p1085_p4, %p1079_p7 }
  0x4a   : > { %1089 = shalt.err (!%p1086_p5)
}
  0x4b   : > { %s1090_s8 = scalar_lea.vmem %s1431_s1, 8192  ;;  %s1274_s9 = smov [#allocation8]  }
  0x4c   : > { %p1091_p6 = scmp.ne.s32.totalorder %s1431_s1, %s1090_s8  ;;  %s1095_s10 = sshll.u32 %s1274_s9, 4  ;;  %s1096_s10 = int_to_ptr.vmem [resolvable:$false] %s1095_s10 }
  0x4d   : > { %s1097_s27 = scalar_lea.vmem %s1096_s10, 16384  ;;  %p1098_p3 = scmp.lt.s32.totalorder %s1431_s1, %s1096_s10 }
  0x4e   : > { %p1093_p10 = pnand %p1091_p6, %p1390_p1  ;;  %p1099_p11 = scmp.lt.s32.totalorder %s1097_s27, %s1090_s8 }
  0x50   : > { %p1094_p13 = pneg %p1093_p10  ;;  %p1100_p8 = por %p1099_p11, %p1098_p3 }
  0x52   : > { %p1101_p9 = pnand %p1100_p8, %p1094_p13 }
  0x54   : > { %1104 = shalt.err (!%p1101_p9)
}
  0x55   : > { %s1738_s17 = smov 16   ;;  %s1739_s12 = smov 256  }
  0x56   : > { %991 = dma.hbm_to_vmem [thread:$0]  (!%p1367_p12), %s1429_s26, 8192, %s1431_s1, %s1435_s15, %s1739_s12, %s1739_s12, %s1738_s17  }
  0x57   : > { %s858_s14 = sshll.u32 %s1269_s21, 4  ;;  %s204_s9 = scalar_lea.vmem [#allocation2], %s1365_s6 }
  0x58   : > { %s1466_s8 = scalar_lea.hbm %s1710_s0, %s858_s14  ;;  %s211_s10 = sshll.u32 %s204_s9, 4  ;;  %s1469_s10 = int_to_ptr.vmem [resolvable:$true] %s211_s10 }
  0x59   : > { %s860_s27 = sshll.u32 %s1365_s6, 1  ;;  %s202_s3 = scalar_lea.sflag [#allocation3], %s1365_s6 }
  0x5a   : > { %s1105_s20 = scalar_lea.hbm %s1466_s8, 16  ;;  %s1110_s17 = scalar_lea.hbm %s1710_s0, 96 }
  0x5b   : > { %p1106_p11 = scmp.ne.s32.totalorder %s1466_s8, %s1105_s20  ;;  %p1111_p2 = scmp.lt.u32.totalorder %s1466_s8, %s1710_s0 }
  0x5c   : > { %p1112_p4 = scmp.lt.u32.totalorder %s1110_s17, %s1105_s20  ;;  %p1114_p6 = scmp.lt.u32.totalorder %s1105_s20, %s1466_s8 }
  0x5d   : > { %p1108_p7 = pnand %p1106_p11, %p1390_p1 }
  0x5e   : > { %p1113_p5 = por %p1112_p4, %p1111_p2 }
  0x5f   : > { %p1109_p0 = pneg %p1108_p7 }
  0x60   : > { %p1115_p10 = por %p1114_p6, %p1113_p5 }
  0x62   : > { %p1116_p13 = pnand %p1115_p10, %p1109_p0 }
  0x64   : > { %1119 = shalt.err (!%p1116_p13)
}
  0x65   : > { %s1120_s11 = scalar_lea.vmem %s1469_s10, 16  ;;  %s1275_s25 = smov [#allocation2]  }
  0x66   : > { %p1121_p3 = scmp.ne.s32.totalorder %s1469_s10, %s1120_s11  ;;  %s1125_s9 = sshll.u32 %s1275_s25, 4  ;;  %s1126_s9 = int_to_ptr.vmem [resolvable:$false] %s1125_s9 }
  0x67   : > { %s1127_s1 = scalar_lea.vmem %s1126_s9, 32  ;;  %p1128_p11 = scmp.lt.s32.totalorder %s1469_s10, %s1126_s9 }
  0x68   : > { %p1123_p8 = pnand %p1121_p3, %p1390_p1  ;;  %p1129_p7 = scmp.lt.s32.totalorder %s1127_s1, %s1120_s11 }
  0x6a   : > { %p1124_p9 = pneg %p1123_p8  ;;  %p1130_p2 = por %p1129_p7, %p1128_p11 }
  0x6c   : > { %p1131_p4 = pnand %p1130_p2, %p1124_p9 }
  0x6e   : > { %1134 = shalt.err (!%p1131_p4)
}
  0x6f   : > { %982 = dma.hbm_to_vmem [thread:$0]  (!%p1367_p12), %s1466_s8, 16, %s1469_s10, %s202_s3  }
  0x70   : > { %s884_s20 = sshll.u32 %s1269_s21, 5  ;;  %s243_s14 = scalar_lea.vmem [#allocation7], %s860_s27 }
  0x71   : > { %s1500_s12 = scalar_lea.hbm %s1712_s2, %s884_s20  ;;  %s251_s11 = sshll.u32 %s243_s14, 4  ;;  %s252_s11 = int_to_ptr.vmem [resolvable:$true] %s251_s11 }
  0x72   : > { %s1135_s25 = scalar_lea.hbm %s1500_s12, 32  ;;  %s1140_s10 = scalar_lea.hbm %s1712_s2, 192 }
  0x73   : > { %p1136_p0 = scmp.ne.s32.totalorder %s1500_s12, %s1135_s25  ;;  %p1141_p10 = scmp.lt.u32.totalorder %s1500_s12, %s1712_s2 }
  0x74   : > { %p1142_p13 = scmp.lt.u32.totalorder %s1140_s10, %s1135_s25  ;;  %p1144_p8 = scmp.lt.u32.totalorder %s1135_s25, %s1500_s12 }
  0x75   : > { %p1138_p5 = pnand %p1136_p0, %p1390_p1 }
  0x76   : > { %p1143_p3 = por %p1142_p13, %p1141_p10 }
  0x77   : > { %p1139_p6 = pneg %p1138_p5 }
  0x78   : > { %p1145_p9 = por %p1144_p8, %p1143_p3 }
  0x7a   : > { %p1146_p11 = pnand %p1145_p9, %p1139_p6 }
  0x7c   : > { %1149 = shalt.err (!%p1146_p11)
}
  0x7d   : > { %s1150_s26 = scalar_lea.vmem %s252_s11, 32  ;;  %s1276_s17 = smov [#allocation7]  }
  0x7e   : > { %p1151_p7 = scmp.ne.s32.totalorder %s252_s11, %s1150_s26  ;;  %s1155_s14 = sshll.u32 %s1276_s17, 4  ;;  %s1156_s14 = int_to_ptr.vmem [resolvable:$false] %s1155_s14 }
  0x7f   : > { %s1157_s3 = scalar_lea.vmem %s1156_s14, 64  ;;  %p1158_p0 = scmp.lt.s32.totalorder %s252_s11, %s1156_s14 }
  0x80   : > { %p1153_p2 = pnand %p1151_p7, %p1390_p1  ;;  %p1159_p5 = scmp.lt.s32.totalorder %s1157_s3, %s1150_s26 }
  0x82   : > { %p1154_p4 = pneg %p1153_p2  ;;  %p1160_p12 = por %p1159_p5, %p1158_p0 }
  0x84   : > { %p1161_p10 = pnand %p1160_p12, %p1154_p4 }
  0x86   : > { %1164 = shalt.err (!%p1161_p10)
}
  0x87   : > { %p1740_p13 = scmp.ne.s32.totalorder %s1731_s7, 0  ;;  %s1527_s10 = scalar_lea.hbm %s1714_s4, %s884_s20 }
  0x88   : > { %s283_s9 = scalar_lea.vmem [#allocation10], %s860_s27  ;;  %s1165_s26 = scalar_lea.hbm %s1527_s10, 32 }
  0x89   : > { %988 = dma.hbm_to_vmem [thread:$0]  (!%p1740_p13), %s1500_s12, 32, %s252_s11, %s1384_s16  }
  0x8a   : > { %s291_s1 = sshll.u32 %s283_s9, 4  ;;  %p1166_p12 = scmp.ne.s32.totalorder %s1527_s10, %s1165_s26  ;;  %s292_s1 = int_to_ptr.vmem [resolvable:$true] %s291_s1 }
  0x8b   : > { %s1170_s11 = scalar_lea.hbm %s1714_s4, 192  ;;  %p1171_p8 = scmp.lt.u32.totalorder %s1527_s10, %s1714_s4 }
  0x8c   : > { %p1168_p6 = pnand %p1166_p12, %p1390_p1  ;;  %p1172_p9 = scmp.lt.u32.totalorder %s1170_s11, %s1165_s26 }
  0x8d   : > { %p1174_p7 = scmp.lt.u32.totalorder %s1165_s26, %s1527_s10 }
  0x8e   : > { %p1169_p3 = pneg %p1168_p6  ;;  %p1173_p11 = por %p1172_p9, %p1171_p8 }
  0x90   : > { %p1175_p2 = por %p1174_p7, %p1173_p11 }
  0x92   : > { %p1176_p4 = pnand %p1175_p2, %p1169_p3 }
  0x94   : > { %1179 = shalt.err (!%p1176_p4)
}
  0x95   : > { %s1180_s6 = scalar_lea.vmem %s292_s1, 32  ;;  %s1277_s27 = smov [#allocation10]  }
  0x96   : > { %p1181_p0 = scmp.ne.s32.totalorder %s292_s1, %s1180_s6  ;;  %s1185_s14 = sshll.u32 %s1277_s27, 4  ;;  %s1186_s14 = int_to_ptr.vmem [resolvable:$false] %s1185_s14 }
  0x97   : > { %s1187_s3 = scalar_lea.vmem %s1186_s14, 64  ;;  %p1188_p12 = scmp.lt.s32.totalorder %s292_s1, %s1186_s14 }
  0x98   : > { %p1183_p5 = pnand %p1181_p0, %p1390_p1  ;;  %p1189_p6 = scmp.lt.s32.totalorder %s1187_s3, %s1180_s6 }
  0x9a   : > { %p1184_p10 = pneg %p1183_p5  ;;  %p1190_p13 = por %p1189_p6, %p1188_p12 }
  0x9c   : > { %p1191_p8 = pnand %p1190_p13, %p1184_p10 }
  0x9e   : > { %1194 = shalt.err (!%p1191_p8)
}
  0x9f   : > { %p1741_p9 = scmp.ne.s32.totalorder %s1731_s7, 0  ;;  %p1742_p3 = scmp.ne.s32.totalorder %s1735_s13, 0 }
  0xa0   : > { %s1552_s23 = sand.u32 (!%p1742_p3), 1, %s1261_s19   ;;  %p1743_p1 = scmp.ne.s32.totalorder (!%p1742_p3), %s1728_s28, 0 }
  0xa1   : > { %994 = dma.hbm_to_vmem [thread:$0]  (!%p1741_p9), %s1527_s10, 32, %s292_s1, %s1435_s15  }
  0xa2   : > { %300 = sbr.rel (%p1742_p3) target bundleno = 686 (0x2ae), region = 40  ;;  %s303_s25 = scalar_lea.sflag (!%p1742_p3), [#allocation3], %s1552_s23 }
  0xa3   : > { %s305_s8 = scalar_lea.vmem (!%p1742_p3), [#allocation2], %s1552_s23 }
  0xa9   : > { %1240 = dma.done.wait (%p1743_p1), %s303_s25, 16  }
  0xaa   : > { %1242 = vsyncadd (%p1743_p1), %s303_s25, 4294967280  ;;  %s310_s7 = sand.u32 1, %s1332_s22   ;;  %s966_s15 = smul.u32 112, %s1552_s23 }
  0xab   : > { %s311_s13 = scalar_lea.sflag [#allocation6], %s310_s7 }
  0xac   : > { %s1562_s10 = scalar_lea.vmem [#allocation5], %s966_s15 }
  0xad   : > { %1244 = dma.done.wait (%p1743_p1), %s311_s13, 1824  }
  0xae   : > { %1246 = vsyncadd (%p1743_p1), %s311_s13, 4294965472  ;;  %s1569_s9 = sshll.u32 %s1552_s23, 1  ;;  %s871_s1 = sshll.u32 %s1552_s23, 9 }
  0xaf   : > { %s323_s26 = scalar_lea.vmem [#allocation7], %s1569_s9  ;;  %s329_s16 = scalar_lea.sflag [#allocation9], %s310_s7 }
  0xb0   : > { %s1573_s12 = scalar_lea.vmem [#allocation8], %s871_s1 }
  0xb1   : > { %1248 = dma.done.wait (%p1743_p1), %s329_s16, 8224  }
  0xb2   : > { %1250 = vsyncadd (%p1743_p1), %s329_s16, 4294959072  ;;  %v1278_v0 = vmov 0.0   ;;  %v389_v1 = vld [vmem:[%s1562_s10 + $0x8] sm:$0xff]  ;;  %v391_v2 = vld [vmem:[%s1562_s10 + $0x18] sm:$0xff]  ;;  %vm414_vm0 = vcmask 457728   ;;  %s341_s28 = scalar_lea.vmem [#allocation10], %s1569_s9 }
  0xb3   : > { %482 = vmatprep.mubr.f32.mxu0 %v1278_v0  ;;  %v388_v3 = vld [vmem:[%s1562_s10] sm:$0xff]  ;;  %v888_v4 = vpack.c.bf16 %v391_v2, %v389_v1  ;;  %v390_v5 = vld [vmem:[%s1562_s10 + $0x10] sm:$0xff]  ;;  %v393_v6 = vld [vmem:[%s1562_s10 + $0x28] sm:$0xff]  ;;  %s887_s11 = sshll.u32 %s1332_s22, 5  ;;  %s386_s17 = scalar_lea.vmem [#allocation11], %s1569_s9 }
  0xb4   : > { %v395_v7 = vld [vmem:[%s1562_s10 + $0x38] sm:$0xff]  ;;  %v890_v8 = vpack.c.bf16 %v390_v5, %v388_v3  ;;  %v392_v10 = vld [vmem:[%s1562_s10 + $0x20] sm:$0xff]  ;;  %v394_v11 = vld [vmem:[%s1562_s10 + $0x30] sm:$0xff]  ;;  %s702_s20 = sshll.u32 %s386_s17, 4  ;;  %s1667_s14 = scalar_lea.hbm %s1715_s5, %s887_s11  ;;  %s1669_s20 = int_to_ptr.vmem [resolvable:$true] %s702_s20 }
  0xb5   : > { %v892_v9 = vpack.c.bf16 %v395_v7, %v393_v6  ;;  %v397_v12 = vld [vmem:[%s1562_s10 + $0x48] sm:$0xff]  ;;  %889 = vmatprep.subr.bf16.mxu0 %v888_v4  ;;  %v399_v13 = vld [vmem:[%s1562_s10 + $0x58] sm:$0xff]  ;;  %v894_v14 = vpack.c.bf16 %v394_v11, %v392_v10  ;;  %v396_v15 = vld [vmem:[%s1562_s10 + $0x40] sm:$0xff]  ;;  %s688_s3 = scalar_lea.sflag [#allocation4], %s1552_s23  ;;  %s1195_s25 = scalar_lea.vmem %s1669_s20, 32 }
  0xb6   : > { %891 = vmatpush1.bf16.msra.mxu0 %v890_v8  ;;  %v398_v16 = vld [vmem:[%s1562_s10 + $0x50] sm:$0xff]  ;;  %v896_v17 = vpack.c.bf16 %v399_v13, %v397_v12  ;;  %v401_v33 = vld [vmem:[%s1562_s10 + $0x68] sm:$0xff]  ;;  %v400_v39 = vld [vmem:[%s1562_s10 + $0x60] sm:$0xff]  ;;  %p1196_p13 = scmp.ne.s32.totalorder %s1669_s20, %s1195_s25  ;;  %p1744_p11 = scmp.ne.s32.totalorder %s1729_s29, 0 }
  0xb7   : > { %893 = vmatprep.subr.bf16.mxu0 %v892_v9  ;;  %v504_v18 = vld [vmem:[%s1573_s12 + $0x8] sm:$0xff]  ;;  %v506_v19 = vld [vmem:[%s1573_s12 + $0x18] sm:$0xff]  ;;  %v503_v20 = vld [vmem:[%s1573_s12] sm:$0xff]  ;;  %v898_v30 = vpack.c.bf16 %v398_v16, %v396_v15  ;;  %s1280_s22 = smov [#allocation11]  }
  0xb8   : > { %v900_v21 = vpack.c.bf16 %v506_v19, %v504_v18  ;;  %v505_v22 = vld [vmem:[%s1573_s12 + $0x10] sm:$0xff]  ;;  %v508_v23 = vld [vmem:[%s1573_s12 + $0x28] sm:$0xff]  ;;  %v510_v24 = vld [vmem:[%s1573_s12 + $0x38] sm:$0xff]  ;;  %p1197_p7 = pnand %p1196_p13, %p1744_p11 }
  0xb9   : > { %v902_v25 = vpack.c.bf16 %v505_v22, %v503_v20  ;;  %v904_v26 = vpack.c.bf16 %v510_v24, %v508_v23  ;;  %v507_v27 = vld [vmem:[%s1573_s12 + $0x20] sm:$0xff]  ;;  %v509_v28 = vld [vmem:[%s1573_s12 + $0x30] sm:$0xff]  ;;  %v512_v29 = vld [vmem:[%s1573_s12 + $0x48] sm:$0xff] }
  0xba   : > { %895 = vmatpush1.bf16.msra.mxu0 %v894_v14  ;;  %901 = vmatprep.subr.bf16.mxu1 %v900_v21  ;;  %v514_v31 = vld [vmem:[%s1573_s12 + $0x58] sm:$0xff]  ;;  %v906_v32 = vpack.c.bf16 %v509_v28, %v507_v27  ;;  %v511_v35 = vld [vmem:[%s1573_s12 + $0x40] sm:$0xff]  ;;  %v513_v36 = vld [vmem:[%s1573_s12 + $0x50] sm:$0xff]  ;;  %p1198_p2 = pneg %p1197_p7 }
  0xbb   : > { %897 = vmatprep.subr.bf16.mxu0 %v896_v17  ;;  %903 = vmatpush1.bf16.msra.mxu1 %v902_v25  ;;  %v908_v34 = vpack.c.bf16 %v514_v31, %v512_v29  ;;  %v516_v37 = vld [vmem:[%s1573_s12 + $0x68] sm:$0xff]  ;;  %v518_v38 = vld [vmem:[%s1573_s12 + $0x78] sm:$0xff]  ;;  %v910_v40 = vpack.c.bf16 %v513_v36, %v511_v35  ;;  %v515_v43 = vld [vmem:[%s1573_s12 + $0x60] sm:$0xff] }
  0xbc   : > { %905 = vmatprep.subr.bf16.mxu1 %v904_v26  ;;  %v387_v41 = vld [vmem:[%s305_s8] sm:$0x1]  ;;  %v912_v42 = vpack.c.bf16 %v518_v38, %v516_v37  ;;  %v517_v44 = vld [vmem:[%s1573_s12 + $0x70] sm:$0xff]  ;;  %v520_v45 = vld [vmem:[%s1573_s12 + $0x88] sm:$0xff]  ;;  %s1199_s8 = sshll.u32 %s1280_s22, 4  ;;  %s1200_s8 = int_to_ptr.vmem [resolvable:$false] %s1199_s8 }
  0xbd   : > { %v522_v46 = vld [vmem:[%s1573_s12 + $0x98] sm:$0xff]  ;;  %v914_v47 = vpack.c.bf16 %v517_v44, %v515_v43  ;;  %v519_v49 = vld [vmem:[%s1573_s12 + $0x80] sm:$0xff]  ;;  %v521_v50 = vld [vmem:[%s1573_s12 + $0x90] sm:$0xff]  ;;  %s1201_s7 = scalar_lea.vmem %s1200_s8, 64  ;;  %p1202_p4 = scmp.lt.s32.totalorder %s1669_s20, %s1200_s8 }
  0xbe   : > { %899 = vmatpush1.bf16.msra.mxu0 %v898_v30  ;;  %v916_v48 = vpack.c.bf16 %v522_v46, %v520_v45  ;;  %v524_v51 = vld [vmem:[%s1573_s12 + $0xa8] sm:$0xff]  ;;  %v526_v52 = vld [vmem:[%s1573_s12 + $0xb8] sm:$0xff]  ;;  %v918_v53 = vpack.c.bf16 %v521_v50, %v519_v49  ;;  %v523_v55 = vld [vmem:[%s1573_s12 + $0xa0] sm:$0xff]  ;;  %p1203_p0 = scmp.lt.s32.totalorder %s1201_s7, %s1195_s25 }
  0xbf   : > { %430 = vmatprep.subr.mxu0 %v401_v33  ;;  %907 = vmatpush1.bf16.msra.mxu1 %v906_v32  ;;  %v920_v54 = vpack.c.bf16 %v526_v52, %v524_v51  ;;  %v525_v56 = vld [vmem:[%s1573_s12 + $0xb0] sm:$0xff]  ;;  %v528_v57 = vld [vmem:[%s1573_s12 + $0xc8] sm:$0xff]  ;;  %v530_v58 = vld [vmem:[%s1573_s12 + $0xd8] sm:$0xff] }
  0xc0   : > { %909 = vmatprep.subr.bf16.mxu1 %v908_v34  ;;  %v922_v59 = vpack.c.bf16 %v525_v56, %v523_v55  ;;  %v924_v60 = vpack.c.bf16 %v530_v58, %v528_v57  ;;  %v527_v61 = vld [vmem:[%s1573_s12 + $0xc0] sm:$0xff]  ;;  %v529_v62 = vld [vmem:[%s1573_s12 + $0xd0] sm:$0xff]  ;;  %v532_v63 = vld [vmem:[%s1573_s12 + $0xe8] sm:$0xff]  ;;  %p1204_p5 = por %p1203_p0, %p1202_p4 }
  0xc1   : > { %v534_v0 = vld [vmem:[%s1573_s12 + $0xf8] sm:$0xff]  ;;  %v926_v1 = vpack.c.bf16 %v529_v62, %v527_v61  ;;  %v531_v3 = vld [vmem:[%s1573_s12 + $0xe0] sm:$0xff]  ;;  %v533_v4 = vld [vmem:[%s1573_s12 + $0xf0] sm:$0xff] }
  0xc2   : > { %431 = vmatpush1.msra.mxu0 %v400_v39  ;;  %v928_v2 = vpack.c.bf16 %v534_v0, %v532_v63  ;;  %v536_v5 = vld [vmem:[%s1573_s12 + $0x108] sm:$0xff]  ;;  %v538_v6 = vld [vmem:[%s1573_s12 + $0x118] sm:$0xff]  ;;  %v930_v7 = vpack.c.bf16 %v533_v4, %v531_v3  ;;  %v535_v9 = vld [vmem:[%s1573_s12 + $0x100] sm:$0xff]  ;;  %p1205_p10 = pnand %p1204_p5, %p1198_p2 }
  0xc3   : > { %874 = vmatmul.mubr.msk.f32.vlgmr.msra.gmra.mrb[0].mxu0 %vm414_vm0, %v387_v41  ;;  %911 = vmatpush1.bf16.msra.mxu1 %v910_v40  ;;  %v932_v8 = vpack.c.bf16 %v538_v6, %v536_v5  ;;  %v537_v10 = vld [vmem:[%s1573_s12 + $0x110] sm:$0xff]  ;;  %v540_v11 = vld [vmem:[%s1573_s12 + $0x128] sm:$0xff]  ;;  %v542_v12 = vld [vmem:[%s1573_s12 + $0x138] sm:$0xff] }
  0xc4   : > { %913 = vmatprep.subr.bf16.mxu1 %v912_v42  ;;  %v934_v13 = vpack.c.bf16 %v537_v10, %v535_v9  ;;  %v936_v14 = vpack.c.bf16 %v542_v12, %v540_v11  ;;  %v539_v15 = vld [vmem:[%s1573_s12 + $0x120] sm:$0xff]  ;;  %v541_v16 = vld [vmem:[%s1573_s12 + $0x130] sm:$0xff]  ;;  %v544_v18 = vld [vmem:[%s1573_s12 + $0x148] sm:$0xff] }
  0xc5   : > { %v938_v17 = vpack.c.bf16 %v541_v16, %v539_v15  ;;  %v546_v19 = vld [vmem:[%s1573_s12 + $0x158] sm:$0xff]  ;;  %v543_v21 = vld [vmem:[%s1573_s12 + $0x140] sm:$0xff]  ;;  %v545_v22 = vld [vmem:[%s1573_s12 + $0x150] sm:$0xff] }
  0xc6   : > { %v940_v20 = vpack.c.bf16 %v546_v19, %v544_v18  ;;  %v942_v23 = vpack.c.bf16 %v545_v22, %v543_v21  ;;  %v548_v24 = vld [vmem:[%s1573_s12 + $0x168] sm:$0xff]  ;;  %v550_v25 = vld [vmem:[%s1573_s12 + $0x178] sm:$0xff]  ;;  %v547_v27 = vld [vmem:[%s1573_s12 + $0x160] sm:$0xff]  ;;  %v1279_v22 = vmov 1966171168  }
  0xc7   : > { %915 = vmatpush1.bf16.msra.mxu1 %v914_v47  ;;  %v944_v26 = vpack.c.bf16 %v550_v25, %v548_v24  ;;  %v549_v28 = vld [vmem:[%s1573_s12 + $0x170] sm:$0xff]  ;;  %v552_v30 = vld [vmem:[%s1573_s12 + $0x188] sm:$0xff]  ;;  %v554_v31 = vld [vmem:[%s1573_s12 + $0x198] sm:$0xff] }
  0xc8   : > { %917 = vmatprep.subr.bf16.mxu1 %v916_v48  ;;  %v946_v29 = vpack.c.bf16 %v549_v28, %v547_v27  ;;  %v948_v32 = vpack.c.bf16 %v554_v31, %v552_v30  ;;  %v551_v33 = vld [vmem:[%s1573_s12 + $0x180] sm:$0xff]  ;;  %v553_v34 = vld [vmem:[%s1573_s12 + $0x190] sm:$0xff]  ;;  %v556_v36 = vld [vmem:[%s1573_s12 + $0x1a8] sm:$0xff] }
  0xc9   : > { %v950_v35 = vpack.c.bf16 %v553_v34, %v551_v33  ;;  %v558_v37 = vld [vmem:[%s1573_s12 + $0x1b8] sm:$0xff]  ;;  %v555_v39 = vld [vmem:[%s1573_s12 + $0x1a0] sm:$0xff]  ;;  %v557_v40 = vld [vmem:[%s1573_s12 + $0x1b0] sm:$0xff] }
  0xca   : > { %v952_v38 = vpack.c.bf16 %v558_v37, %v556_v36  ;;  %v954_v41 = vpack.c.bf16 %v557_v40, %v555_v39  ;;  %v560_v42 = vld [vmem:[%s1573_s12 + $0x1c8] sm:$0xff]  ;;  %v562_v43 = vld [vmem:[%s1573_s12 + $0x1d8] sm:$0xff]  ;;  %v559_v45 = vld [vmem:[%s1573_s12 + $0x1c0] sm:$0xff] }
  0xcb   : > { %919 = vmatpush1.bf16.msra.mxu1 %v918_v53  ;;  %v956_v44 = vpack.c.bf16 %v562_v43, %v560_v42  ;;  %v561_v46 = vld [vmem:[%s1573_s12 + $0x1d0] sm:$0xff]  ;;  %v564_v48 = vld [vmem:[%s1573_s12 + $0x1e8] sm:$0xff]  ;;  %v566_v49 = vld [vmem:[%s1573_s12 + $0x1f8] sm:$0xff] }
  0xcc   : > { %921 = vmatprep.subr.bf16.mxu1 %v920_v54  ;;  %v958_v47 = vpack.c.bf16 %v561_v46, %v559_v45  ;;  %v563_v50 = vld [vmem:[%s1573_s12 + $0x1e0] sm:$0xff]  ;;  %v960_v51 = vpack.c.bf16 %v566_v49, %v564_v48  ;;  %v565_v52 = vld [vmem:[%s1573_s12 + $0x1f0] sm:$0xff]  ;;  %v404_v54 = vlaneseq  ;;  %v402_v57 = vld [vmem:[%s323_s26] sm:$0x3] }
  0xcd   : > { %v962_v53 = vpack.c.bf16 %v565_v52, %v563_v50 }
  0xce   : > { %v405_v55 = vshrl.u32 %v404_v54, 7  ;;  %vm684_vm5 = vcmp.lt.s32.totalorder %v404_v54, 256 }
  0xcf   : > { %923 = vmatpush1.bf16.msra.mxu1 %v922_v59 }
  0xd0   : > { %925 = vmatprep.subr.bf16.mxu1 %v924_v60  ;;  %v406_v56 = vsub.s32 0, %v405_v55  ;;  %v410_v58 = vsub.s32 1, %v405_v55 }
  0xd2   : > { %v407_v59 = vrot.slane %v402_v57, %v406_v56  ;;  %v411_v60 = vrot.slane %v402_v57, %v410_v58 }
  0xd3   : > { %927 = vmatpush1.bf16.msra.mxu1 %v926_v1 }
  0xd4   : > { %929 = vmatprep.subr.bf16.mxu1 %v928_v2 }
  0xd7   : > { %931 = vmatpush1.bf16.msra.mxu1 %v930_v7 }
  0xd8   : > { %933 = vmatprep.subr.bf16.mxu1 %v932_v8 }
  0xdb   : > { %935 = vmatpush1.bf16.msra.mxu1 %v934_v13  ;;  %v567_v13 = vld [vmem:[%s341_s28] sm:$0x3] }
  0xdc   : > { %937 = vmatprep.subr.bf16.mxu1 %v936_v14  ;;  %v572_v14 = vrot.slane %v567_v13, %v406_v56  ;;  %v576_v15 = vrot.slane %v567_v13, %v410_v58 }
  0xdf   : > { %939 = vmatpush1.bf16.msra.mxu1 %v938_v17 }
  0xe0   : > { %941 = vmatprep.subr.bf16.mxu1 %v940_v20 }
  0xe3   : > { %943 = vmatpush1.bf16.msra.mxu1 %v942_v23  ;;  %v668_v23 = vunpack.c.l.s4 %v1279_v22 }
  0xe4   : > { %945 = vmatprep.subr.bf16.mxu1 %v944_v26 }
  0xe7   : > { %947 = vmatpush1.bf16.msra.mxu1 %v946_v29  ;;  %v669_v29 = vunpack.c.0.s8 %v668_v23 }
  0xe8   : > { %949 = vmatprep.subr.bf16.mxu1 %v948_v32 }
  0xeb   : > { %951 = vmatpush1.bf16.msra.mxu1 %v950_v35  ;;  %v672_v35 = vsub.s32 %v669_v29, %v405_v55 }
  0xec   : > { %953 = vmatprep.subr.bf16.mxu1 %v952_v38 }
  0xef   : > { %955 = vmatpush1.bf16.msra.mxu1 %v954_v41 }
  0xf0   : > { %957 = vmatprep.subr.bf16.mxu1 %v956_v44 }
  0xf3   : > { %959 = vmatpush1.bf16.msra.mxu1 %v958_v47 }
  0xf4   : > { %961 = vmatprep.subr.bf16.mxu1 %v960_v51 }
  0xf7   : > { %963 = vmatpush1.bf16.msra.mxu1 %v962_v53 }
 0x196   : > { %v484_v61 = vpop.f32.mrb[0].mxu0 }
 0x197   : > { %v485_v62 = vadd.f32 %v484_v61, %v407_v59  ;;  %v486_v63 = vpop.f32.mrb[1].mxu0 }
 0x198   : > { %v487_v0 = vadd.f32 %v486_v63, %v411_v60 }
 0x199   : > { %v491_v1 = vmul.f32 1.442695, %v485_v62  ;;  %vm489_vm1 = vcmp.gt.f32.partialorder %v485_v62, 0.0 }
 0x19a   : > { %v493_v2 = vmul.f32 1.442695, %v487_v0  ;;  %vm490_vm2 = vcmp.gt.f32.partialorder %v487_v0, 0.0 }
 0x19b   : > { %1037 = vpow2.f32 %v491_v1 }
 0x19c   : > { %1039 = vpow2.f32 %v493_v2 }
 0x1a5   : > { %v1038_v3 = vpop.eup %1037 }
 0x1a6   : > { %v1040_v4 = vpop.eup %1039  ;;  %v875_v5 = vadd.f32 -1.0, %v1038_v3 }
 0x1a7   : > { %v876_v6 = vadd.f32 -1.0, %v1040_v4 }
 0x1a8   : > { %v497_v7 = vmul.f32 1.6732632, %v875_v5 }
 0x1a9   : > { %v498_v8 = vmul.f32 1.6732632, %v876_v6 }
 0x1aa   : > { %v499_v9 = vsel %vm489_vm1, %v485_v62, %v497_v7 }
 0x1ab   : > { %v500_v10 = vsel %vm490_vm2, %v487_v0, %v498_v8  ;;  %v501_v12 = vmul.f32 1.050701, %v499_v9 }
 0x1ac   : > { %v502_v11 = vmul.f32 1.050701, %v500_v10 }
 0x1ae   : > { %643 = vmatprep.mubr.f32.mxu1 %v502_v11 }
 0x1af   : > { %644 = vmatmul.mubr.f32.vlgmr.msra.gmra.mrb[0].mxu1 %v501_v12 }
 0x282   : > { %v645_v16 = vpop.f32.mrb[0].mxu1 }
 0x283   : > { %v646_v17 = vadd.f32 %v645_v16, %v572_v14  ;;  %v647_v18 = vpop.f32.mrb[1].mxu1 }
 0x284   : > { %v648_v19 = vadd.f32 %v647_v18, %v576_v15 }
 0x285   : > { %v652_v20 = vmul.f32 1.442695, %v646_v17  ;;  %vm650_vm3 = vcmp.gt.f32.partialorder %v646_v17, 0.0 }
 0x286   : > { %v654_v21 = vmul.f32 1.442695, %v648_v19  ;;  %vm651_vm4 = vcmp.gt.f32.partialorder %v648_v19, 0.0 }
 0x287   : > { %1041 = vpow2.f32 %v652_v20 }
 0x288   : > { %1043 = vpow2.f32 %v654_v21 }
 0x291   : > { %v1042_v24 = vpop.eup %1041 }
 0x292   : > { %v1044_v25 = vpop.eup %1043  ;;  %v877_v26 = vadd.f32 -1.0, %v1042_v24 }
 0x293   : > { %v878_v27 = vadd.f32 -1.0, %v1044_v25 }
 0x294   : > { %v658_v28 = vmul.f32 1.6732632, %v877_v26 }
 0x295   : > { %v659_v30 = vmul.f32 1.6732632, %v878_v27 }
 0x296   : > { %v660_v31 = vsel %vm650_vm3, %v646_v17, %v658_v28 }
 0x297   : > { %v662_v32 = vmul.f32 1.050701, %v660_v31  ;;  %v661_v33 = vsel %vm651_vm4, %v648_v19, %v659_v30 }
 0x298   : > { %v663_v34 = vmul.f32 1.050701, %v661_v33 }
 0x29a   : > { %v666_v36 = vcombine.low %v662_v32, %v663_v34 }
 0x29c   : > { %v673_v37 = vrot.slane %v666_v36, %v672_v35 }
 0x29e   : > { %v680_v38 = vrot.slane %v673_v37, %v672_v35 }
 0x2a0   : > { %686 = vst.msk [vmem:[%s386_s17] sm:$0x3] %vm684_vm5, %v680_v38 }
 0x2a1   : > { %1208 = shalt.err (!%p1205_p10)
}
 0x2a2   : > { %s1209_s23 = scalar_lea.hbm %s1667_s14, 32  ;;  %s1213_s10 = scalar_lea.hbm %s1715_s5, 192 }
 0x2a3   : > { %p1210_p12 = scmp.ne.s32.totalorder %s1667_s14, %s1209_s23  ;;  %p1214_p9 = scmp.lt.u32.totalorder %s1667_s14, %s1715_s5 }
 0x2a4   : > { %p1215_p3 = scmp.lt.u32.totalorder %s1213_s10, %s1209_s23  ;;  %p1217_p13 = scmp.lt.u32.totalorder %s1209_s23, %s1667_s14 }
 0x2a5   : > { %p1211_p6 = pnand %p1210_p12, %p1744_p11 }
 0x2a6   : > { %p1216_p1 = por %p1215_p3, %p1214_p9 }
 0x2a7   : > { %p1212_p8 = pneg %p1211_p6 }
 0x2a8   : > { %p1218_p7 = por %p1217_p13, %p1216_p1 }
 0x2aa   : > { %p1219_p2 = pnand %p1218_p7, %p1212_p8 }
 0x2ac   : > { %1222 = shalt.err (!%p1219_p2)
}
 0x2ad   : > { %977 = dma.vmem_to_hbm [thread:$0]  (%p1744_p11), %s1669_s20, 32, %s1667_s14, %s688_s3  }
 0x2ae PF: > { %p1000_p4 = scmp.ge.s32.totalorder %s1269_s21, 2  ;;  %s714_s26 = sand.u32 1, %s1257_s18  }
 0x2af   : > { %p1745_p0 = scmp.ne.s32.totalorder %s1730_s30, 0  ;;  %s715_s16 = scalar_lea.sflag [#allocation4], %s714_s26 }
 0x2b1   : > { %p996_p5 = pnand %p1000_p4, %p1745_p0 }
 0x2b3   : > { %1252 = dma.done.wait (!%p996_p5), %s715_s16, 32  }
 0x2b4   : > { %1254 = vsyncadd (!%p996_p5), %s715_s16, 4294967264  ;;  %s1746_s12 = sld [smem:[#allocation16_spill]]  ;;  %s1747_s20 = sld [smem:[#allocation17_spill]] }
 0x2b5   : > { %p24_p10 = scmp.ge.s32.totalorder %s1336_s24, 8   ;;  %s1748_s18 = smov %s1261_s19 }
 0x2b6   : > { %s1750_s21 = smov %s1336_s24 }
 0x2b7   :  { %26 = sbr.rel (!%p24_p10) target bundleno = 12 (0xc), region = 133 }
 0x2ba   : > { %s1749_s19 = smov %s1746_s12 }
 0x2be   :  { %720 = vsyncpa [#allocation3], 1 }
 0x2bf   :  { %722 = vsyncpa [#allocation3 + $0x1], 1 }
 0x2c0   :  { %723 = vsyncpa [#allocation6], 1 }
 0x2c1   :  { %725 = vsyncpa [#allocation6 + $0x1], 1 }
 0x2c2   :  { %726 = vsyncpa [#allocation9], 1 }
 0x2c3   :  { %728 = vsyncpa [#allocation9 + $0x1], 1 }
 0x2c4   :  { %729 = vsyncpa [#allocation4], 1 }
 0x2c5   :  { %731 = vsyncpa [#allocation4 + $0x1], 1 }

</bundles_post_ra>
